<compile_context>
chip_gen: v7x
topology: tpu7x:2x2x1
jax: 0.10.0
libtpu: 0.0.40
codegen_flags: <defaults>
</compile_context>

<pallas_src>
import functools

import numpy as np
import jax
import jax.numpy as jnp
from jax import lax
from jax.experimental import pallas as pl
from jax.experimental.pallas import tpu as pltpu


def _round_up(a, b):
    return (a + b - 1) // b * b


def _rudy_kernel(xmin_ref, xmax_ref, ch_ref, cv_ref,      # (1, K)
                 ymin_ref, ymax_ref,                      # (K, 1)
                 init_h_ref, init_v_ref,                  # (tile_x, nby_pad)
                 route_ref, h_ref, v_ref,                 # (tile_x, nby_pad)
                 acc_h, acc_v,                            # f32 scratch (tile_x, nby_pad)
                 *, xl, yl, bsx, bsy, tile_x):
    i = pl.program_id(0)          # map x-tile (parallel)
    g = pl.program_id(1)          # net block (reduction)
    txb, nby = acc_h.shape

    @pl.when(g == 0)
    def _():
        acc_h[...] = jnp.zeros_like(acc_h)
        acc_v[...] = jnp.zeros_like(acc_v)

    # Bin edges: x edges as a (tile_x, 1) column (sublanes), y edges as a
    # (1, nby_pad) row (lanes).  Padded bins lie outside the layout, so their
    # clipped overlap is 0 and they contribute nothing.
    row_ids = lax.broadcasted_iota(jnp.int32, (txb, 1), 0) + i * tile_x
    bx_lo = xl + row_ids.astype(jnp.float32) * bsx
    bx_hi = bx_lo + bsx
    col_ids = lax.broadcasted_iota(jnp.int32, (1, nby), 1)
    by_lo = yl + col_ids.astype(jnp.float32) * bsy
    by_hi = by_lo + bsy

    # Separable clipped overlaps for this block of K nets.
    ov_x = jnp.maximum(jnp.minimum(xmax_ref[...], bx_hi)
                       - jnp.maximum(xmin_ref[...], bx_lo), 0.0)   # (tile_x, K)
    ov_y = jnp.maximum(jnp.minimum(ymax_ref[...], by_hi)
                       - jnp.maximum(ymin_ref[...], by_lo), 0.0)   # (K, nby_pad)

    a_h = ov_x * ch_ref[...]       # per-net scale (weight, 1/bbox-area, dx, map scale) folded in
    a_v = ov_x * cv_ref[...]
    acc_h[...] += jnp.dot(a_h, ov_y, preferred_element_type=jnp.float32)
    acc_v[...] += jnp.dot(a_v, ov_y, preferred_element_type=jnp.float32)

    @pl.when(g == pl.num_programs(1) - 1)
    def _():
        h = acc_h[...] + init_h_ref[...].astype(jnp.float32)
        v = acc_v[...] + init_v_ref[...].astype(jnp.float32)
        h_ref[...] = h.astype(h_ref.dtype)
        v_ref[...] = v.astype(v_ref.dtype)
        route_ref[...] = jnp.maximum(jnp.abs(h), jnp.abs(v)).astype(route_ref.dtype)


class RudyPallas:
    """Mirror of the PyTorch Rudy module; forward implemented with Pallas."""

    NET_BLOCK = 256   # K nets per MXU outer-product step (multiple of 128)

    def __init__(self, netpin_start, flat_netpin, net_weights, xl, xh, yl, yh,
                 num_bins_x, num_bins_y, unit_horizontal_capacity,
                 unit_vertical_capacity, deterministic_flag,
                 initial_horizontal_utilization_map=None,
                 initial_vertical_utilization_map=None):
        netpin_start_np = np.asarray(netpin_start, np.int64)
        self.num_nets = int(netpin_start_np.shape[0] - 1)
        counts = np.diff(netpin_start_np)
        # Segment ids for the vectorized per-net bbox reduction (host-side, static).
        self.seg_ids = jnp.asarray(
            np.repeat(np.arange(self.num_nets, dtype=np.int32), counts), jnp.int32)
        self.net_mask = jnp.asarray(counts > 0)
        self.flat_netpin = jnp.asarray(flat_netpin, jnp.int32)
        self.net_weights = jnp.asarray(net_weights, jnp.float32)

        self.xl, self.xh, self.yl, self.yh = float(xl), float(xh), float(yl), float(yh)
        self.num_bins_x = int(num_bins_x)
        self.num_bins_y = int(num_bins_y)
        self.bin_size_x = (self.xh - self.xl) / self.num_bins_x
        self.bin_size_y = (self.yh - self.yl) / self.num_bins_y
        bin_area = self.bin_size_x * self.bin_size_y
        self.inv_h_scale = 1.0 / (bin_area * float(unit_horizontal_capacity))
        self.inv_v_scale = 1.0 / (bin_area * float(unit_vertical_capacity))
        self.deterministic_flag = deterministic_flag   # kernel is deterministic by construction
        self.initial_horizontal_utilization_map = initial_horizontal_utilization_map
        self.initial_vertical_utilization_map = initial_vertical_utilization_map

        # Padded map layout: lane-dense y (multiple of 128), sublane-aligned x
        # (multiple of 8).  The x axis is tiled so v7x can split it across its
        # two TensorCores ("parallel" grid axis).
        self.nby_pad = _round_up(self.num_bins_y, 128)
        if self.num_bins_x <= 256:
            self.tile_x = _round_up(self.num_bins_x, 8)
            self.nbx_pad = self.tile_x
        else:
            self.tile_x = 256
            self.nbx_pad = _round_up(self.num_bins_x, 256)
        self.n_xtiles = self.nbx_pad // self.tile_x
        self.nets_padded = max(1, _round_up(max(self.num_nets, 1), self.NET_BLOCK))
        self.n_net_blocks = self.nets_padded // self.NET_BLOCK

    def _padded_init_map(self, m, dtype):
        if m is None:
            return jnp.zeros((self.nbx_pad, self.nby_pad), dtype)
        m = jnp.asarray(m, dtype).reshape(self.num_bins_x, self.num_bins_y)
        return jnp.pad(m, ((0, self.nbx_pad - self.num_bins_x),
                           (0, self.nby_pad - self.num_bins_y)))

    def __call__(self, pin_pos):
        pin_pos = jnp.asarray(pin_pos)
        dtype = pin_pos.dtype
        nbx, nby = self.num_bins_x, self.num_bins_y
        n, n_pad = self.num_nets, self.nets_padded
        K = self.NET_BLOCK
        eps = float(np.finfo(np.float32).eps)

        # ---- per-net bounding boxes (vectorized scatter-min/max; no serial pin loop) ----
        xs = pin_pos[2 * self.flat_netpin].astype(jnp.float32)
        ys = pin_pos[2 * self.flat_netpin + 1].astype(jnp.float32)
        inf = jnp.float32(jnp.inf)
        x_min = jnp.full((n,), inf, jnp.float32).at[self.seg_ids].min(xs)
        x_max = jnp.full((n,), -inf, jnp.float32).at[self.seg_ids].max(xs)
        y_min = jnp.full((n,), inf, jnp.float32).at[self.seg_ids].min(ys)
        y_max = jnp.full((n,), -inf, jnp.float32).at[self.seg_ids].max(ys)

        dx = x_max - x_min
        dy = y_max - y_min
        c = self.net_weights / ((dx + eps) * (dy + eps))
        c_h = c * dx * self.inv_h_scale
        c_v = c * dy * self.inv_v_scale

        # Guard empty nets (collapsed bbox, zero contribution).
        x_min = jnp.where(self.net_mask, x_min, self.xl)
        x_max = jnp.where(self.net_mask, x_max, self.xl)
        y_min = jnp.where(self.net_mask, y_min, self.yl)
        y_max = jnp.where(self.net_mask, y_max, self.yl)
        c_h = jnp.where(self.net_mask, c_h, 0.0)
        c_v = jnp.where(self.net_mask, c_v, 0.0)

        # Pad the net dimension to a multiple of the block size (padding nets are inert).
        pad = n_pad - n
        x_min = jnp.pad(x_min, (0, pad), constant_values=self.xl)
        x_max = jnp.pad(x_max, (0, pad), constant_values=self.xl)
        y_min = jnp.pad(y_min, (0, pad), constant_values=self.yl)
        y_max = jnp.pad(y_max, (0, pad), constant_values=self.yl)
        c_h = jnp.pad(c_h, (0, pad))
        c_v = jnp.pad(c_v, (0, pad))

        # Layouts for the kernel: x-related quantities live along lanes (1, N),
        # y-related along sublanes (N, 1) so the outer product needs no transpose.
        x_min2 = x_min.reshape(1, n_pad)
        x_max2 = x_max.reshape(1, n_pad)
        c_h2 = c_h.reshape(1, n_pad)
        c_v2 = c_v.reshape(1, n_pad)
        y_min2 = y_min.reshape(n_pad, 1)
        y_max2 = y_max.reshape(n_pad, 1)

        init_h_p = self._padded_init_map(self.initial_horizontal_utilization_map, dtype)
        init_v_p = self._padded_init_map(self.initial_vertical_utilization_map, dtype)

        kernel = functools.partial(
            _rudy_kernel,
            xl=self.xl, yl=self.yl,
            bsx=self.bin_size_x, bsy=self.bin_size_y,
            tile_x=self.tile_x)

        x_spec = pl.BlockSpec((1, K), lambda i, g: (0, g))
        y_spec = pl.BlockSpec((K, 1), lambda i, g: (g, 0))
        map_spec = pl.BlockSpec((self.tile_x, self.nby_pad), lambda i, g: (i, 0))

        route_p, h_p, v_p = pl.pallas_call(
            kernel,
            grid=(self.n_xtiles, self.n_net_blocks),
            in_specs=[x_spec, x_spec, x_spec, x_spec,   # x_min, x_max, c_h, c_v
                      y_spec, y_spec,                   # y_min, y_max
                      map_spec, map_spec],              # init_h, init_v
            out_specs=(map_spec, map_spec, map_spec),
            out_shape=(jax.ShapeDtypeStruct((self.nbx_pad, self.nby_pad), dtype),
                       jax.ShapeDtypeStruct((self.nbx_pad, self.nby_pad), dtype),
                       jax.ShapeDtypeStruct((self.nbx_pad, self.nby_pad), dtype)),
            scratch_shapes=[pltpu.VMEM((self.tile_x, self.nby_pad), jnp.float32),
                            pltpu.VMEM((self.tile_x, self.nby_pad), jnp.float32)],
            compiler_params=pltpu.CompilerParams(
                dimension_semantics=("parallel", "arbitrary")),
        )(x_min2, x_max2, c_h2, c_v2, y_min2, y_max2, init_h_p, init_v_p)

        route = route_p[:nbx, :nby]
        h_map = h_p[:nbx, :nby]
        v_map = v_p[:nbx, :nby]
        return route, h_map, v_map


def rudy_reference(pin_pos, netpin_start, flat_netpin, net_weights,
                   xl, yl, xh, yh, num_bins_x, num_bins_y,
                   unit_h_cap, unit_v_cap, init_h=None, init_v=None):
    """Pure numpy reference mirroring the C++ RUDY kernel semantics."""
    pin_pos = np.asarray(pin_pos, np.float64)
    netpin_start = np.asarray(netpin_start)
    flat_netpin = np.asarray(flat_netpin)
    net_weights = np.asarray(net_weights, np.float64)
    bsx = (xh - xl) / num_bins_x
    bsy = (yh - yl) / num_bins_y
    eps = float(np.finfo(np.float32).eps)
    h = np.zeros((num_bins_x, num_bins_y), np.float64)
    v = np.zeros_like(h)
    for i in range(len(netpin_start) - 1):
        pins = flat_netpin[netpin_start[i]:netpin_start[i + 1]]
        xs = pin_pos[2 * pins]
        ys = pin_pos[2 * pins + 1]
        x_min, x_max = xs.min(), xs.max()
        y_min, y_max = ys.min(), ys.max()
        dx, dy = x_max - x_min, y_max - y_min
        wt = net_weights[i]
        for bx in range(num_bins_x):
            for by in range(num_bins_y):
                bxl = xl + bx * bsx
                byl = yl + by * bsy
                ovx = max(min(x_max, bxl + bsx) - max(x_min, bxl), 0.0)
                ovy = max(min(y_max, byl + bsy) - max(y_min, byl), 0.0)
                ov = ovx * ovy * wt / ((dx + eps) * (dy + eps))
                h[bx, by] += ov * dx
                v[bx, by] += ov * dy
    bin_area = bsx * bsy
    h *= 1.0 / (bin_area * unit_h_cap)
    v *= 1.0 / (bin_area * unit_v_cap)
    if init_h is not None:
        h += np.asarray(init_h, np.float64).reshape(num_bins_x, num_bins_y)
    if init_v is not None:
        v += np.asarray(init_v, np.float64).reshape(num_bins_x, num_bins_y)
    route = np.maximum(np.abs(h), np.abs(v))
    return route, h, v


if __name__ == "__main__":
    key = jax.random.PRNGKey(0)

    # Layout / problem parameters (small, deterministic).
    xl, xh, yl, yh = 0.0, 16.0, 0.0, 16.0
    num_bins_x, num_bins_y = 16, 16
    unit_h_cap, unit_v_cap = 1.6, 1.4

    num_nets = 6
    netpin_start = jnp.asarray([0, 3, 6, 10, 13, 17, 20], jnp.int32)
    num_pins = 20
    k1, k2, k3, k4, k5 = jax.random.split(key, 5)
    flat_netpin = jax.random.permutation(k1, jnp.arange(num_pins, dtype=jnp.int32))
    net_weights = jax.random.uniform(k2, (num_nets,), jnp.float32, 0.5, 1.5)
    # pin positions, flat xyxyxy... in [xl, xh] x [yl, yh]
    pin_pos = jax.random.uniform(k3, (2 * num_pins,), jnp.float32, 0.5, 15.5)
    # nonzero initial utilization maps to exercise the scale-then-add path
    init_h = jax.random.uniform(k4, (num_bins_x, num_bins_y), jnp.float32, 0.0, 0.1)
    init_v = jax.random.uniform(k5, (num_bins_x, num_bins_y), jnp.float32, 0.0, 0.1)

    rudy = RudyPallas(netpin_start, flat_netpin, net_weights,
                      xl, xh, yl, yh, num_bins_x, num_bins_y,
                      unit_h_cap, unit_v_cap, deterministic_flag=True,
                      initial_horizontal_utilization_map=init_h,
                      initial_vertical_utilization_map=init_v)

    route, h_map, v_map = rudy(pin_pos)
    jax.block_until_ready((route, h_map, v_map))

    # Numerical sanity check against the numpy reference.
    r_ref, h_ref, v_ref = rudy_reference(pin_pos, netpin_start, flat_netpin,
                                         net_weights, xl, yl, xh, yh,
                                         num_bins_x, num_bins_y,
                                         unit_h_cap, unit_v_cap,
                                         init_h=init_h, init_v=init_v)
    np.testing.assert_allclose(np.asarray(h_map), h_ref, rtol=1e-4, atol=1e-4)
    np.testing.assert_allclose(np.asarray(v_map), v_ref, rtol=1e-4, atol=1e-4)
    np.testing.assert_allclose(np.asarray(route), r_ref, rtol=1e-4, atol=1e-4)

    print("KERNEL_OK")
</pallas_src>

<mosaic_0001>
module attributes {stable_mosaic.version = 11 : i64} {
  func.func @_rudy_kernel(%arg0: i32, %arg1: i32, %arg2: memref<1x256xf32, #tpu.memory_space<vmem>>, %arg3: memref<1x256xf32, #tpu.memory_space<vmem>>, %arg4: memref<1x256xf32, #tpu.memory_space<vmem>>, %arg5: memref<1x256xf32, #tpu.memory_space<vmem>>, %arg6: memref<256x1xf32, #tpu.memory_space<vmem>>, %arg7: memref<256x1xf32, #tpu.memory_space<vmem>>, %arg8: memref<16x128xf32, #tpu.memory_space<vmem>>, %arg9: memref<16x128xf32, #tpu.memory_space<vmem>>, %arg10: memref<16x128xf32, #tpu.memory_space<vmem>>, %arg11: memref<16x128xf32, #tpu.memory_space<vmem>>, %arg12: memref<16x128xf32, #tpu.memory_space<vmem>>, %arg13: memref<16x128xf32, #tpu.memory_space<vmem>>, %arg14: memref<16x128xf32, #tpu.memory_space<vmem>>) attributes {dimension_semantics = [#tpu.dimension_semantics<parallel>, #tpu.dimension_semantics<arbitrary>], iteration_bounds = array<i64: 1, 1>, scalar_prefetch = 0 : i64, scratch_operands = 2 : i64, tpu.core_type = #tpu.core_type<tc>, window_params = [{transform_indices = @transform_0, window_bounds = array<i64: 1, 256>}, {transform_indices = @transform_1, window_bounds = array<i64: 1, 256>}, {transform_indices = @transform_2, window_bounds = array<i64: 1, 256>}, {transform_indices = @transform_3, window_bounds = array<i64: 1, 256>}, {transform_indices = @transform_4, window_bounds = array<i64: 256, 1>}, {transform_indices = @transform_5, window_bounds = array<i64: 256, 1>}, {transform_indices = @transform_6, window_bounds = array<i64: 16, 128>}, {transform_indices = @transform_7, window_bounds = array<i64: 16, 128>}, {transform_indices = @transform_8, window_bounds = array<i64: 16, 128>}, {transform_indices = @transform_9, window_bounds = array<i64: 16, 128>}, {transform_indices = @transform_10, window_bounds = array<i64: 16, 128>}]} {
    %c0_i32 = arith.constant 0 : i32
    %0 = arith.cmpi eq, %arg1, %c0_i32 : i32
    %1 = arith.extui %0 : i1 to i32
    %c0_i32_0 = arith.constant 0 : i32
    %2 = arith.cmpi ne, %1, %c0_i32_0 : i32
    scf.if %2 {
      %cst_31 = arith.constant 0.000000e+00 : f32
      %61 = vector.broadcast %cst_31 : f32 to vector<16x128xf32>
      %c0_32 = arith.constant 0 : index
      %c0_33 = arith.constant 0 : index
      %62 = vector.load %arg13[%c0_32, %c0_33] : memref<16x128xf32, #tpu.memory_space<vmem>>, vector<16x128xf32>
      tpu.vector_store %arg13[%c0_32, %c0_33], %61 {strides = array<i32>} : memref<16x128xf32, #tpu.memory_space<vmem>>, vector<16x128xf32>,
      %cst_34 = arith.constant 0.000000e+00 : f32
      %63 = vector.broadcast %cst_34 : f32 to vector<16x128xf32>
      %c0_35 = arith.constant 0 : index
      %c0_36 = arith.constant 0 : index
      %64 = vector.load %arg14[%c0_35, %c0_36] : memref<16x128xf32, #tpu.memory_space<vmem>>, vector<16x128xf32>
      tpu.vector_store %arg14[%c0_35, %c0_36], %63 {strides = array<i32>} : memref<16x128xf32, #tpu.memory_space<vmem>>, vector<16x128xf32>,
    } else {
    }
    %3 = tpu.iota {dimensions = array<i32: 0>} : vector<16x1xi32>
    %c16_i32 = arith.constant 16 : i32
    %4 = arith.muli %arg0, %c16_i32 : i32
    %5 = vector.broadcast %4 : i32 to vector<16x1xi32>
    %6 = arith.addi %3, %5 : vector<16x1xi32>
    %7 = arith.sitofp %6 : vector<16x1xi32> to vector<16x1xf32>
    %cst = arith.constant 1.000000e+00 : f32
    %8 = vector.broadcast %cst : f32 to vector<16x1xf32>
    %9 = arith.mulf %7, %8 : vector<16x1xf32>
    %cst_1 = arith.constant 0.000000e+00 : f32
    %10 = vector.broadcast %cst_1 : f32 to vector<16x1xf32>
    %11 = arith.addf %10, %9 : vector<16x1xf32>
    %cst_2 = arith.constant 1.000000e+00 : f32
    %12 = vector.broadcast %cst_2 : f32 to vector<16x1xf32>
    %13 = arith.addf %11, %12 : vector<16x1xf32>
    %14 = tpu.iota {dimensions = array<i32: 1>} : vector<1x128xi32>
    %15 = arith.sitofp %14 : vector<1x128xi32> to vector<1x128xf32>
    %cst_3 = arith.constant 1.000000e+00 : f32
    %16 = vector.broadcast %cst_3 : f32 to vector<1x128xf32>
    %17 = arith.mulf %15, %16 : vector<1x128xf32>
    %cst_4 = arith.constant 0.000000e+00 : f32
    %18 = vector.broadcast %cst_4 : f32 to vector<1x128xf32>
    %19 = arith.addf %18, %17 : vector<1x128xf32>
    %cst_5 = arith.constant 1.000000e+00 : f32
    %20 = vector.broadcast %cst_5 : f32 to vector<1x128xf32>
    %21 = arith.addf %19, %20 : vector<1x128xf32>
    %c0 = arith.constant 0 : index
    %c0_6 = arith.constant 0 : index
    %22 = vector.load %arg3[%c0, %c0_6] : memref<1x256xf32, #tpu.memory_space<vmem>>, vector<1x256xf32>
    %23 = vector.broadcast %22 : vector<1x256xf32> to vector<16x256xf32>
    %24 = vector.broadcast %13 : vector<16x1xf32> to vector<16x256xf32>
    %25 = arith.minimumf %23, %24 : vector<16x256xf32>
    %c0_7 = arith.constant 0 : index
    %c0_8 = arith.constant 0 : index
    %26 = vector.load %arg2[%c0_7, %c0_8] : memref<1x256xf32, #tpu.memory_space<vmem>>, vector<1x256xf32>
    %27 = vector.broadcast %26 : vector<1x256xf32> to vector<16x256xf32>
    %28 = vector.broadcast %11 : vector<16x1xf32> to vector<16x256xf32>
    %29 = arith.maximumf %27, %28 : vector<16x256xf32>
    %30 = arith.subf %25, %29 : vector<16x256xf32>
    %cst_9 = arith.constant 0.000000e+00 : f32
    %31 = vector.broadcast %cst_9 : f32 to vector<16x256xf32>
    %32 = arith.maximumf %30, %31 : vector<16x256xf32>
    %c0_10 = arith.constant 0 : index
    %c0_11 = arith.constant 0 : index
    %33 = vector.load %arg7[%c0_10, %c0_11] : memref<256x1xf32, #tpu.memory_space<vmem>>, vector<256x1xf32>
    %34 = vector.broadcast %33 : vector<256x1xf32> to vector<256x128xf32>
    %35 = vector.broadcast %21 : vector<1x128xf32> to vector<256x128xf32>
    %36 = arith.minimumf %34, %35 : vector<256x128xf32>
    %c0_12 = arith.constant 0 : index
    %c0_13 = arith.constant 0 : index
    %37 = vector.load %arg6[%c0_12, %c0_13] : memref<256x1xf32, #tpu.memory_space<vmem>>, vector<256x1xf32>
    %38 = vector.broadcast %37 : vector<256x1xf32> to vector<256x128xf32>
    %39 = vector.broadcast %19 : vector<1x128xf32> to vector<256x128xf32>
    %40 = arith.maximumf %38, %39 : vector<256x128xf32>
    %41 = arith.subf %36, %40 : vector<256x128xf32>
    %cst_14 = arith.constant 0.000000e+00 : f32
    %42 = vector.broadcast %cst_14 : f32 to vector<256x128xf32>
    %43 = arith.maximumf %41, %42 : vector<256x128xf32>
    %c0_15 = arith.constant 0 : index
    %c0_16 = arith.constant 0 : index
    %44 = vector.load %arg4[%c0_15, %c0_16] : memref<1x256xf32, #tpu.memory_space<vmem>>, vector<1x256xf32>
    %45 = vector.broadcast %44 : vector<1x256xf32> to vector<16x256xf32>
    %46 = arith.mulf %32, %45 : vector<16x256xf32>
    %c0_17 = arith.constant 0 : index
    %c0_18 = arith.constant 0 : index
    %47 = vector.load %arg5[%c0_17, %c0_18] : memref<1x256xf32, #tpu.memory_space<vmem>>, vector<1x256xf32>
    %48 = vector.broadcast %47 : vector<1x256xf32> to vector<16x256xf32>
    %49 = arith.mulf %32, %48 : vector<16x256xf32>
    %c0_19 = arith.constant 0 : index
    %c0_20 = arith.constant 0 : index
    %50 = vector.load %arg13[%c0_19, %c0_20] : memref<16x128xf32, #tpu.memory_space<vmem>>, vector<16x128xf32>
    %cst_21 = arith.constant dense<0.000000e+00> : vector<16x128xf32>
    %51 = tpu.matmul %46, %43, %cst_21 {dimension_numbers = #tpu.dot_dimension_numbers<[1], [0], [0], [1], [0, 0, 1, 1], [], []>} : vector<16x256xf32>, vector<256x128xf32>, vector<16x128xf32> -> vector<16x128xf32>
    %52 = arith.addf %50, %51 : vector<16x128xf32>
    %c0_22 = arith.constant 0 : index
    %c0_23 = arith.constant 0 : index
    %53 = vector.load %arg13[%c0_22, %c0_23] : memref<16x128xf32, #tpu.memory_space<vmem>>, vector<16x128xf32>
    tpu.vector_store %arg13[%c0_22, %c0_23], %52 {strides = array<i32>} : memref<16x128xf32, #tpu.memory_space<vmem>>, vector<16x128xf32>,
    %c0_24 = arith.constant 0 : index
    %c0_25 = arith.constant 0 : index
    %54 = vector.load %arg14[%c0_24, %c0_25] : memref<16x128xf32, #tpu.memory_space<vmem>>, vector<16x128xf32>
    %cst_26 = arith.constant dense<0.000000e+00> : vector<16x128xf32>
    %55 = tpu.matmul %49, %43, %cst_26 {dimension_numbers = #tpu.dot_dimension_numbers<[1], [0], [0], [1], [0, 0, 1, 1], [], []>} : vector<16x256xf32>, vector<256x128xf32>, vector<16x128xf32> -> vector<16x128xf32>
    %56 = arith.addf %54, %55 : vector<16x128xf32>
    %c0_27 = arith.constant 0 : index
    %c0_28 = arith.constant 0 : index
    %57 = vector.load %arg14[%c0_27, %c0_28] : memref<16x128xf32, #tpu.memory_space<vmem>>, vector<16x128xf32>
    tpu.vector_store %arg14[%c0_27, %c0_28], %56 {strides = array<i32>} : memref<16x128xf32, #tpu.memory_space<vmem>>, vector<16x128xf32>,
    %c0_i32_29 = arith.constant 0 : i32
    %58 = arith.cmpi eq, %arg1, %c0_i32_29 : i32
    %59 = arith.extui %58 : i1 to i32
    %c0_i32_30 = arith.constant 0 : i32
    %60 = arith.cmpi ne, %59, %c0_i32_30 : i32
    scf.if %60 {
      %c0_31 = arith.constant 0 : index
      %c0_32 = arith.constant 0 : index
      %61 = vector.load %arg13[%c0_31, %c0_32] : memref<16x128xf32, #tpu.memory_space<vmem>>, vector<16x128xf32>
      %c0_33 = arith.constant 0 : index
      %c0_34 = arith.constant 0 : index
      %62 = vector.load %arg8[%c0_33, %c0_34] : memref<16x128xf32, #tpu.memory_space<vmem>>, vector<16x128xf32>
      %63 = arith.addf %61, %62 : vector<16x128xf32>
      %c0_35 = arith.constant 0 : index
      %c0_36 = arith.constant 0 : index
      %64 = vector.load %arg14[%c0_35, %c0_36] : memref<16x128xf32, #tpu.memory_space<vmem>>, vector<16x128xf32>
      %c0_37 = arith.constant 0 : index
      %c0_38 = arith.constant 0 : index
      %65 = vector.load %arg9[%c0_37, %c0_38] : memref<16x128xf32, #tpu.memory_space<vmem>>, vector<16x128xf32>
      %66 = arith.addf %64, %65 : vector<16x128xf32>
      %c0_39 = arith.constant 0 : index
      %c0_40 = arith.constant 0 : index
      %67 = vector.load %arg11[%c0_39, %c0_40] : memref<16x128xf32, #tpu.memory_space<vmem>>, vector<16x128xf32>
      tpu.vector_store %arg11[%c0_39, %c0_40], %63 {strides = array<i32>} : memref<16x128xf32, #tpu.memory_space<vmem>>, vector<16x128xf32>,
      %c0_41 = arith.constant 0 : index
      %c0_42 = arith.constant 0 : index
      %68 = vector.load %arg12[%c0_41, %c0_42] : memref<16x128xf32, #tpu.memory_space<vmem>>, vector<16x128xf32>
      tpu.vector_store %arg12[%c0_41, %c0_42], %66 {strides = array<i32>} : memref<16x128xf32, #tpu.memory_space<vmem>>, vector<16x128xf32>,
      %69 = math.absf %63 : vector<16x128xf32>
      %70 = math.absf %66 : vector<16x128xf32>
      %71 = arith.maximumf %69, %70 : vector<16x128xf32>
      %c0_43 = arith.constant 0 : index
      %c0_44 = arith.constant 0 : index
      %72 = vector.load %arg10[%c0_43, %c0_44] : memref<16x128xf32, #tpu.memory_space<vmem>>, vector<16x128xf32>
      tpu.vector_store %arg10[%c0_43, %c0_44], %71 {strides = array<i32>} : memref<16x128xf32, #tpu.memory_space<vmem>>, vector<16x128xf32>,
    } else {
    }
    return
  }
  func.func @transform_0(%arg0: i32, %arg1: i32) -> (i32, i32) {
    %c0_i32 = arith.constant 0 : i32
    %c0_i32_0 = arith.constant 0 : i32
    return %c0_i32, %arg1 : i32, i32
  }
  func.func @transform_1(%arg0: i32, %arg1: i32) -> (i32, i32) {
    %c0_i32 = arith.constant 0 : i32
    %c0_i32_0 = arith.constant 0 : i32
    return %c0_i32, %arg1 : i32, i32
  }
  func.func @transform_2(%arg0: i32, %arg1: i32) -> (i32, i32) {
    %c0_i32 = arith.constant 0 : i32
    %c0_i32_0 = arith.constant 0 : i32
    return %c0_i32, %arg1 : i32, i32
  }
  func.func @transform_3(%arg0: i32, %arg1: i32) -> (i32, i32) {
    %c0_i32 = arith.constant 0 : i32
    %c0_i32_0 = arith.constant 0 : i32
    return %c0_i32, %arg1 : i32, i32
  }
  func.func @transform_4(%arg0: i32, %arg1: i32) -> (i32, i32) {
    %c0_i32 = arith.constant 0 : i32
    %c0_i32_0 = arith.constant 0 : i32
    return %arg1, %c0_i32 : i32, i32
  }
  func.func @transform_5(%arg0: i32, %arg1: i32) -> (i32, i32) {
    %c0_i32 = arith.constant 0 : i32
    %c0_i32_0 = arith.constant 0 : i32
    return %arg1, %c0_i32 : i32, i32
  }
  func.func @transform_6(%arg0: i32, %arg1: i32) -> (i32, i32) {
    %c0_i32 = arith.constant 0 : i32
    %c0_i32_0 = arith.constant 0 : i32
    return %arg0, %c0_i32 : i32, i32
  }
  func.func @transform_7(%arg0: i32, %arg1: i32) -> (i32, i32) {
    %c0_i32 = arith.constant 0 : i32
    %c0_i32_0 = arith.constant 0 : i32
    return %arg0, %c0_i32 : i32, i32
  }
  func.func @transform_8(%arg0: i32, %arg1: i32) -> (i32, i32) {
    %c0_i32 = arith.constant 0 : i32
    %c0_i32_0 = arith.constant 0 : i32
    return %arg0, %c0_i32 : i32, i32
  }
  func.func @transform_9(%arg0: i32, %arg1: i32) -> (i32, i32) {
    %c0_i32 = arith.constant 0 : i32
    %c0_i32_0 = arith.constant 0 : i32
    return %arg0, %c0_i32 : i32, i32
  }
  func.func @transform_10(%arg0: i32, %arg1: i32) -> (i32, i32) {
    %c0_i32 = arith.constant 0 : i32
    %c0_i32_0 = arith.constant 0 : i32
    return %arg0, %c0_i32 : i32, i32
  }
}

</mosaic_0001>

<bundles_post_ra>
// kernel: tpu_custom_call.1
= control target key start
LH: loop header
LB: loop body
LE: loop exit
PB: predicated region body
PF: predicated region fallthrough
CT: control target
= control target key end

     0   :  { %16 = vsyncpa [#allocation5], 0  ;;  %v1098_v2 = vmov 0   ;;  %s1521_s0 = inlined_call_operand.vmem [shape: f32[1,256], index: 0, kind: input, shape index: {}]   ;;  %s1522_s1 = inlined_call_operand.vmem [shape: f32[1,256], index: 1, kind: input, shape index: {}]   ;;  %s1523_s2 = inlined_call_operand.vmem [shape: f32[1,256], index: 2, kind: input, shape index: {}]   ;;  %s1524_s3 = inlined_call_operand.vmem [shape: f32[1,256], index: 3, kind: input, shape index: {}]   ;;  %s1525_s4 = inlined_call_operand.vmem [shape: f32[256,1], index: 4, kind: input, shape index: {}]   ;;  %s1526_s5 = inlined_call_operand.vmem [shape: f32[256,1], index: 5, kind: input, shape index: {}]   ;;  %s1527_s6 = inlined_call_operand.vmem [shape: f32[16,128], index: 6, kind: input, shape index: {}]   ;;  %s1528_s7 = inlined_call_operand.vmem [shape: f32[16,128], index: 7, kind: input, shape index: {}]   ;;  %s1529_s8 = inlined_call_operand.hbm [shape: f32[16,128], index: 8, kind: output, shape index: {0}]   ;;  %s1530_s9 = inlined_call_operand.hbm [shape: f32[16,128], index: 9, kind: output, shape index: {1}]   ;;  %s1531_s10 = inlined_call_operand.hbm [shape: f32[16,128], index: 10, kind: output, shape index: {2}]  }
   0x1   :  { %v340_v0 = vld [vmem:[%s1525_s4 + $0x80] sm:$0xff]  ;;  %1027 = vset.pattern.permute.xlu1 %v1098_v2  ;;  %1026 = vset.pattern.permute.xlu0 %v1098_v2  ;;  %v341_v3 = vld [vmem:[%s1525_s4 + $0x88] sm:$0xff]  ;;  %v119_v9 = vld [vmem:[%s1526_s5 + $0x98] sm:$0xff] }
   0x2   :  { %v116_v1 = vld [vmem:[%s1526_s5 + $0x80] sm:$0xff]  ;;  %438 = vperm.xlu1 %1027, %v340_v0   ;;  %v117_v4 = vld [vmem:[%s1526_s5 + $0x88] sm:$0xff]  ;;  %v118_v10 = vld [vmem:[%s1526_s5 + $0x90] sm:$0xff] }
   0x3   :  { %214 = vperm.xlu0 %1026, %v116_v1   ;;  %v101_v5 = vld [vmem:[%s1526_s5 + $0x8] sm:$0xff]  ;;  %v100_v6 = vld [vmem:[%s1526_s5] sm:$0xff]  ;;  %v343_v11 = vld [vmem:[%s1525_s4 + $0x98] sm:$0xff] }
   0x4   :  { %v325_v7 = vld [vmem:[%s1525_s4 + $0x8] sm:$0xff]  ;;  %v324_v8 = vld [vmem:[%s1525_s4] sm:$0xff]  ;;  %v342_v12 = vld [vmem:[%s1525_s4 + $0x90] sm:$0xff] }
   0x6   :  { %443 = vperm.xlu1 %1027, %v341_v3  }
   0x7   :  { %219 = vperm.xlu0 %1026, %v117_v4  }
   0xa   :  { %139 = vperm.xlu1 %1027, %v101_v5  }
   0xb   :  { %134 = vperm.xlu0 %1026, %v100_v6  }
   0xe   :  { %363 = vperm.xlu1 %1027, %v325_v7  }
   0xf   :  { %358 = vperm.xlu0 %1026, %v324_v8  }
  0x12   :  { %229 = vperm.xlu1 %1027, %v119_v9  }
  0x13   :  { %224 = vperm.xlu0 %1026, %v118_v10  }
  0x14   :  { %17 = vsyncpa [#allocation7], 0  ;;  %v103_v13 = vld [vmem:[%s1526_s5 + $0x18] sm:$0xff]  ;;  %v102_v14 = vld [vmem:[%s1526_s5 + $0x10] sm:$0xff]  ;;  %v42_v59 = vlaneseq  ;;  %s1099_s11 = smov [#allocation6]   ;;  %s1100_s13 = smov [#allocation8]  }
  0x15   :  { %v327_v15 = vld [vmem:[%s1525_s4 + $0x18] sm:$0xff]  ;;  %v326_v16 = vld [vmem:[%s1525_s4 + $0x10] sm:$0xff]  ;;  %v121_v17 = vld [vmem:[%s1526_s5 + $0xa8] sm:$0xff]  ;;  %s850_s12 = sshll.u32 %s1099_s11, 4  ;;  %s862_s14 = sshll.u32 %s1100_s13, 4  ;;  %s851_s12 = int_to_ptr.vmem [resolvable:$true] %s850_s12  ;;  %s1462_s14 = int_to_ptr.vmem [resolvable:$true] %s862_s14 }
  0x16   :  { %453 = vperm.xlu1 %1027, %v343_v11   ;;  %v120_v18 = vld [vmem:[%s1526_s5 + $0xa0] sm:$0xff]  ;;  %v345_v19 = vld [vmem:[%s1525_s4 + $0xa8] sm:$0xff]  ;;  %v123_v25 = vld [vmem:[%s1526_s5 + $0xb8] sm:$0xff]  ;;  %v56_v62 = vand.u32 127, %v42_v59  ;;  %v43_v2 = vshrl.u32 %v42_v59, 7  ;;  %s1101_s15 = smov [#allocation4]   ;;  %p1033_p1 = scmp.lt.s32.totalorder %s851_s12, %s851_s12 }
  0x17   :  { %448 = vperm.xlu0 %1026, %v342_v12   ;;  %v344_v20 = vld [vmem:[%s1525_s4 + $0xa0] sm:$0xff]  ;;  %v105_v21 = vld [vmem:[%s1526_s5 + $0x28] sm:$0xff]  ;;  %v122_v26 = vld [vmem:[%s1526_s5 + $0xb0] sm:$0xff]  ;;  %s838_s16 = sshll.u32 %s1101_s15, 4  ;;  %s1464_s16 = int_to_ptr.vmem [resolvable:$true] %s838_s16 }
  0x18   :  { %v104_v22 = vld [vmem:[%s1526_s5 + $0x20] sm:$0xff]  ;;  %v329_v23 = vld [vmem:[%s1525_s4 + $0x28] sm:$0xff]  ;;  %v347_v27 = vld [vmem:[%s1525_s4 + $0xb8] sm:$0xff]  ;;  %v1345_v1 = vcvt.s32.f32 %v56_v62  ;;  %v49_v5 = vcvt.s32.f32 %v43_v2  ;;  %v68_v6 = vsub.s32 1, %v43_v2  ;;  %v64_v9 = vsub.s32 0, %v43_v2 }
  0x19   :  { %v328_v24 = vld [vmem:[%s1525_s4 + $0x20] sm:$0xff]  ;;  %v346_v28 = vld [vmem:[%s1525_s4 + $0xb0] sm:$0xff]  ;;  %v107_v29 = vld [vmem:[%s1526_s5 + $0x38] sm:$0xff] }
  0x1a   :  { %149 = vperm.xlu1 %1027, %v103_v13   ;;  %v106_v30 = vld [vmem:[%s1526_s5 + $0x30] sm:$0xff]  ;;  %v331_v31 = vld [vmem:[%s1525_s4 + $0x38] sm:$0xff]  ;;  %v125_v33 = vld [vmem:[%s1526_s5 + $0xc8] sm:$0xff]  ;;  %v1354_v7 = vadd.f32 1.0, %v1345_v1  ;;  %v53_v11 = vadd.f32 1.0, %v49_v5 }
  0x1b   :  { %144 = vperm.xlu0 %1026, %v102_v14   ;;  %v330_v32 = vld [vmem:[%s1525_s4 + $0x30] sm:$0xff]  ;;  %v124_v34 = vld [vmem:[%s1526_s5 + $0xc0] sm:$0xff]  ;;  %v349_v35 = vld [vmem:[%s1525_s4 + $0xc8] sm:$0xff]  ;;  %v44_v14 = vadd.s32 8, %v43_v2 }
  0x1c   :  { %v348_v36 = vld [vmem:[%s1525_s4 + $0xc0] sm:$0xff]  ;;  %v109_v37 = vld [vmem:[%s1526_s5 + $0x48] sm:$0xff]  ;;  %v127_v41 = vld [vmem:[%s1526_s5 + $0xd8] sm:$0xff] }
  0x1d   :  { %v108_v38 = vld [vmem:[%s1526_s5 + $0x40] sm:$0xff]  ;;  %v333_v39 = vld [vmem:[%s1525_s4 + $0x48] sm:$0xff]  ;;  %v126_v42 = vld [vmem:[%s1526_s5 + $0xd0] sm:$0xff] }
  0x1e   :  { %373 = vperm.xlu1 %1027, %v327_v15   ;;  %v332_v40 = vld [vmem:[%s1525_s4 + $0x40] sm:$0xff]  ;;  %v351_v43 = vld [vmem:[%s1525_s4 + $0xd8] sm:$0xff]  ;;  %v350_v44 = vld [vmem:[%s1525_s4 + $0xd0] sm:$0xff] }
  0x1f   :  { %368 = vperm.xlu0 %1026, %v326_v16   ;;  %v111_v45 = vld [vmem:[%s1526_s5 + $0x58] sm:$0xff]  ;;  %v110_v46 = vld [vmem:[%s1526_s5 + $0x50] sm:$0xff]  ;;  %v129_v49 = vld [vmem:[%s1526_s5 + $0xe8] sm:$0xff] }
  0x20   :  { %v335_v47 = vld [vmem:[%s1525_s4 + $0x58] sm:$0xff]  ;;  %v334_v48 = vld [vmem:[%s1525_s4 + $0x50] sm:$0xff]  ;;  %v128_v50 = vld [vmem:[%s1526_s5 + $0xe0] sm:$0xff] }
  0x21   :  { %v353_v51 = vld [vmem:[%s1525_s4 + $0xe8] sm:$0xff]  ;;  %v352_v52 = vld [vmem:[%s1525_s4 + $0xe0] sm:$0xff]  ;;  %v131_v57 = vld [vmem:[%s1526_s5 + $0xf8] sm:$0xff] }
  0x22   :  { %239 = vperm.xlu1 %1027, %v121_v17   ;;  %v113_v53 = vld [vmem:[%s1526_s5 + $0x68] sm:$0xff]  ;;  %v112_v54 = vld [vmem:[%s1526_s5 + $0x60] sm:$0xff]  ;;  %v130_v58 = vld [vmem:[%s1526_s5 + $0xf0] sm:$0xff] }
  0x23   :  { %234 = vperm.xlu0 %1026, %v120_v18   ;;  %v337_v55 = vld [vmem:[%s1525_s4 + $0x68] sm:$0xff]  ;;  %v336_v56 = vld [vmem:[%s1525_s4 + $0x60] sm:$0xff]  ;;  %v355_v60 = vld [vmem:[%s1525_s4 + $0xf8] sm:$0xff] }
  0x24   :  { %v354_v61 = vld [vmem:[%s1525_s4 + $0xf0] sm:$0xff]  ;;  %v115_v63 = vld [vmem:[%s1526_s5 + $0x78] sm:$0xff]  ;;  %v60_v8 = vld [vmem:[%s1522_s1] sm:$0x3] }
  0x25   :  { %v114_v0 = vld [vmem:[%s1526_s5 + $0x70] sm:$0xff]  ;;  %v339_v3 = vld [vmem:[%s1525_s4 + $0x78] sm:$0xff]  ;;  %v76_v10 = vld [vmem:[%s1521_s0] sm:$0x3]  ;;  %v69_v12 = vrot.slane %v60_v8, %v68_v6  ;;  %v65_v15 = vrot.slane %v60_v8, %v64_v9 }
  0x26   :  { %463 = vperm.xlu1 %1027, %v345_v19   ;;  %v338_v4 = vld [vmem:[%s1525_s4 + $0x70] sm:$0xff]  ;;  %v85_v13 = vrot.slane %v76_v10, %v68_v6  ;;  %v81_v16 = vrot.slane %v76_v10, %v64_v9  ;;  %v50_v19 = vcvt.s32.f32 %v44_v14 }
  0x27   :  { %458 = vperm.xlu0 %1026, %v344_v20   ;;  %v73_v17 = vmin.f32 %v69_v12, %v53_v11 }
  0x28   :  { %v89_v18 = vmax.f32 %v85_v13, %v49_v5 }
  0x2a   :  { %159 = vperm.xlu1 %1027, %v105_v21  }
  0x2b   :  { %154 = vperm.xlu0 %1026, %v104_v22   ;;  %v72_v22 = vmin.f32 %v65_v15, %v53_v11 }
  0x2e   :  { %383 = vperm.xlu1 %1027, %v329_v23   ;;  %v88_v23 = vmax.f32 %v81_v16, %v49_v5 }
  0x2f   :  { %378 = vperm.xlu0 %1026, %v328_v24  }
  0x32   :  { %249 = vperm.xlu1 %1027, %v123_v25  }
  0x33   :  { %244 = vperm.xlu0 %1026, %v122_v26   ;;  %v93_v26 = vsub.f32 %v73_v17, %v89_v18 }
  0x36   :  { %473 = vperm.xlu1 %1027, %v347_v27   ;;  %v54_v27 = vadd.f32 1.0, %v50_v19 }
  0x37   :  { %468 = vperm.xlu0 %1026, %v346_v28   ;;  %v612_v28 = vld [vmem:[%s1523_s2] sm:$0x3] }
  0x3a   :  { %169 = vperm.xlu1 %1027, %v107_v29   ;;  %v628_v29 = vld [vmem:[%s1524_s3] sm:$0x3] }
  0x3b   :  { %164 = vperm.xlu0 %1026, %v106_v30   ;;  %v92_v30 = vsub.f32 %v72_v22, %v88_v23 }
  0x3e   :  { %393 = vperm.xlu1 %1027, %v331_v31   ;;  %v97_v31 = vmax.f32 %v93_v26, 0.0 }
  0x3f   :  { %388 = vperm.xlu0 %1026, %v330_v32   ;;  %v621_v32 = vrot.slane %v612_v28, %v68_v6 }
  0x42   :  { %259 = vperm.xlu1 %1027, %v125_v33   ;;  %v637_v33 = vrot.slane %v628_v29, %v68_v6 }
  0x43   :  { %254 = vperm.xlu0 %1026, %v124_v34  }
  0x46   :  { %483 = vperm.xlu1 %1027, %v349_v35  }
  0x47   :  { %478 = vperm.xlu0 %1026, %v348_v36   ;;  %v617_v36 = vrot.slane %v612_v28, %v64_v9 }
  0x4a   :  { %179 = vperm.xlu1 %1027, %v109_v37   ;;  %v633_v37 = vrot.slane %v628_v29, %v64_v9 }
  0x4b   :  { %174 = vperm.xlu0 %1026, %v108_v38   ;;  %v96_v38 = vmax.f32 %v92_v30, 0.0 }
  0x4e   :  { %403 = vperm.xlu1 %1027, %v333_v39   ;;  %v75_v39 = vmin.f32 %v69_v12, %v54_v27 }
  0x4f   :  { %398 = vperm.xlu0 %1026, %v332_v40  }
  0x52   :  { %269 = vperm.xlu1 %1027, %v127_v41  }
  0x53   :  { %264 = vperm.xlu0 %1026, %v126_v42  }
  0x56   :  { %493 = vperm.xlu1 %1027, %v351_v43   ;;  %v625_v43 = vmul.f32 %v621_v32, %v97_v31 }
  0x57   :  { %488 = vperm.xlu0 %1026, %v350_v44   ;;  %v641_v44 = vmul.f32 %v637_v33, %v97_v31 }
  0x58   :  { %710 = vmatprep.mubr.f32.mxu0 %v625_v43 }
  0x59   :  { %791 = vmatprep.mubr.f32.mxu1 %v641_v44 }
  0x5a   :  { %189 = vperm.xlu1 %1027, %v111_v45   ;;  %v1372_v45 = vmul.f32 %v617_v36, %v96_v38 }
  0x5b   :  { %184 = vperm.xlu0 %1026, %v110_v46   ;;  %v1374_v46 = vmul.f32 %v633_v37, %v96_v38 }
  0x5e   :  { %413 = vperm.xlu1 %1027, %v335_v47   ;;  %v91_v47 = vmax.f32 %v85_v13, %v50_v19 }
  0x5f   :  { %408 = vperm.xlu0 %1026, %v334_v48  }
  0x62   :  { %279 = vperm.xlu1 %1027, %v129_v49   ;;  %v74_v49 = vmin.f32 %v65_v15, %v54_v27 }
  0x63   :  { %274 = vperm.xlu0 %1026, %v128_v50   ;;  %v90_v50 = vmax.f32 %v81_v16, %v50_v19 }
  0x66   :  { %503 = vperm.xlu1 %1027, %v353_v51  }
  0x67   :  { %498 = vperm.xlu0 %1026, %v352_v52  }
  0x6a   :  { %199 = vperm.xlu1 %1027, %v113_v53   ;;  %v95_v53 = vsub.f32 %v75_v39, %v91_v47 }
  0x6b   :  { %194 = vperm.xlu0 %1026, %v112_v54  }
  0x6e   :  { %423 = vperm.xlu1 %1027, %v337_v55  }
  0x6f   :  { %418 = vperm.xlu0 %1026, %v336_v56   ;;  %v94_v56 = vsub.f32 %v74_v49, %v90_v50 }
  0x71   :  { %v98_v59 = vmax.f32 %v94_v56, 0.0 }
  0x72   :  { %289 = vperm.xlu1 %1027, %v131_v57   ;;  %v99_v57 = vmax.f32 %v95_v53, 0.0 }
  0x73   :  { %284 = vperm.xlu0 %1026, %v130_v58   ;;  %v1384_v5 = vmul.f32 %v617_v36, %v98_v59  ;;  %v1386_v6 = vmul.f32 %v633_v37, %v98_v59 }
  0x74   :  { %v1380_v2 = vmul.f32 %v637_v33, %v99_v57 }
  0x76   :  { %513 = vperm.xlu1 %1027, %v355_v60  }
  0x77   :  { %508 = vperm.xlu0 %1026, %v354_v61  }
  0x7a   :  { %209 = vperm.xlu1 %1027, %v115_v63  }
  0x7b   :  { %204 = vperm.xlu0 %1026, %v114_v0   ;;  %v1378_v0 = vmul.f32 %v621_v32, %v99_v57 }
  0x7e   :  { %433 = vperm.xlu1 %1027, %v339_v3  }
  0x7f   :  { %428 = vperm.xlu0 %1026, %v338_v4  }
  0x81   :  { %v439_v20 = vpop.permute.xlu1 %438 }
  0x82   :  { %v215_v21 = vpop.permute.xlu0 %214  ;;  %v532_v24 = vmax.f32 %v439_v20, %v1345_v1 }
  0x83   :  { %v308_v25 = vmin.f32 %v215_v21, %v1354_v7 }
  0x85   :  { %v444_v34 = vpop.permute.xlu1 %443  ;;  %v564_v40 = vsub.f32 %v308_v25, %v532_v24 }
  0x86   :  { %v220_v35 = vpop.permute.xlu0 %219  ;;  %v533_v41 = vmax.f32 %v444_v34, %v1345_v1 }
  0x87   :  { %v309_v42 = vmin.f32 %v220_v35, %v1354_v7  ;;  %v596_v54 = vmax.f32 %v564_v40, 0.0 }
  0x89   :  { %v565_v48 = vsub.f32 %v309_v42, %v533_v41  ;;  %v140_v51 = vpop.permute.xlu1 %139 }
  0x8a   :  { %v135_v52 = vpop.permute.xlu0 %134  ;;  %v293_v60 = vmin.f32 %v140_v51, %v1354_v7 }
  0x8b   :  { %v597_v55 = vmax.f32 %v565_v48, 0.0  ;;  %v292_v61 = vmin.f32 %v135_v52, %v1354_v7 }
  0x8d   :  { %v956_v58 = vpack.c.bf16 %v597_v55, %v596_v54  ;;  %v364_v62 = vpop.permute.xlu1 %363 }
  0x8e   :  { %v359_v63 = vpop.permute.xlu0 %358  ;;  %v517_v3 = vmax.f32 %v364_v62, %v1345_v1 }
  0x8f   :  { %v516_v4 = vmax.f32 %v359_v63, %v1345_v1  ;;  %957 = vmatprep.subr.bf16.mxu0 %v956_v58  ;;  %989 = vmatprep.subr.bf16.mxu1 %v956_v58 }
  0x90   :  { %v549_v8 = vsub.f32 %v293_v60, %v517_v3 }
  0x91   :  { %v548_v9 = vsub.f32 %v292_v61, %v516_v4  ;;  %v230_v10 = vpop.permute.xlu1 %229 }
  0x92   :  { %v225_v11 = vpop.permute.xlu0 %224  ;;  %v581_v12 = vmax.f32 %v549_v8, 0.0  ;;  %v311_v15 = vmin.f32 %v230_v10, %v1354_v7 }
  0x93   :  { %v580_v13 = vmax.f32 %v548_v9, 0.0  ;;  %v310_v18 = vmin.f32 %v225_v11, %v1354_v7 }
  0x95   :  { %v958_v14 = vpack.c.bf16 %v581_v12, %v580_v13  ;;  %v454_v16 = vpop.permute.xlu1 %453 }
  0x96   :  { %v449_v17 = vpop.permute.xlu0 %448  ;;  %v535_v19 = vmax.f32 %v454_v16, %v1345_v1 }
  0x97   :  { %v534_v20 = vmax.f32 %v449_v17, %v1345_v1  ;;  %959 = vmatpush3.bf16.msra.mxu0 %v958_v14  ;;  %991 = vmatpush3.bf16.msra.mxu1 %v958_v14 }
  0x98   :  { %v567_v21 = vsub.f32 %v311_v15, %v535_v19 }
  0x99   :  { %v566_v22 = vsub.f32 %v310_v18, %v534_v20  ;;  %v150_v23 = vpop.permute.xlu1 %149 }
  0x9a   :  { %v145_v24 = vpop.permute.xlu0 %144  ;;  %v599_v25 = vmax.f32 %v567_v21, 0.0  ;;  %v295_v28 = vmin.f32 %v150_v23, %v1354_v7 }
  0x9b   :  { %v598_v26 = vmax.f32 %v566_v22, 0.0  ;;  %v294_v31 = vmin.f32 %v145_v24, %v1354_v7 }
  0x9d   :  { %v960_v27 = vpack.c.bf16 %v599_v25, %v598_v26  ;;  %v374_v29 = vpop.permute.xlu1 %373 }
  0x9e   :  { %v369_v30 = vpop.permute.xlu0 %368  ;;  %v519_v32 = vmax.f32 %v374_v29, %v1345_v1 }
  0x9f   :  { %v518_v33 = vmax.f32 %v369_v30, %v1345_v1  ;;  %961 = vmatprep.subr.bf16.mxu0 %v960_v27  ;;  %993 = vmatprep.subr.bf16.mxu1 %v960_v27 }
  0xa0   :  { %v551_v34 = vsub.f32 %v295_v28, %v519_v32 }
  0xa1   :  { %v550_v35 = vsub.f32 %v294_v31, %v518_v33  ;;  %v240_v36 = vpop.permute.xlu1 %239 }
  0xa2   :  { %v235_v37 = vpop.permute.xlu0 %234  ;;  %v583_v38 = vmax.f32 %v551_v34, 0.0  ;;  %v313_v41 = vmin.f32 %v240_v36, %v1354_v7 }
  0xa3   :  { %v582_v39 = vmax.f32 %v550_v35, 0.0  ;;  %v312_v44 = vmin.f32 %v235_v37, %v1354_v7 }
  0xa5   :  { %v962_v40 = vpack.c.bf16 %v583_v38, %v582_v39  ;;  %v464_v42 = vpop.permute.xlu1 %463 }
  0xa6   :  { %v459_v43 = vpop.permute.xlu0 %458  ;;  %v537_v47 = vmax.f32 %v464_v42, %v1345_v1 }
  0xa7   :  { %v536_v48 = vmax.f32 %v459_v43, %v1345_v1  ;;  %963 = vmatpush3.bf16.msra.mxu0 %v962_v40  ;;  %995 = vmatpush3.bf16.msra.mxu1 %v962_v40 }
  0xa8   :  { %v569_v49 = vsub.f32 %v313_v41, %v537_v47 }
  0xa9   :  { %v568_v50 = vsub.f32 %v312_v44, %v536_v48  ;;  %v160_v51 = vpop.permute.xlu1 %159 }
  0xaa   :  { %v155_v52 = vpop.permute.xlu0 %154  ;;  %v601_v53 = vmax.f32 %v569_v49, 0.0  ;;  %v297_v56 = vmin.f32 %v160_v51, %v1354_v7 }
  0xab   :  { %v600_v54 = vmax.f32 %v568_v50, 0.0  ;;  %v296_v59 = vmin.f32 %v155_v52, %v1354_v7 }
  0xad   :  { %v964_v55 = vpack.c.bf16 %v601_v53, %v600_v54  ;;  %v384_v57 = vpop.permute.xlu1 %383 }
  0xae   :  { %v379_v58 = vpop.permute.xlu0 %378  ;;  %v521_v60 = vmax.f32 %v384_v57, %v1345_v1 }
  0xaf   :  { %v520_v61 = vmax.f32 %v379_v58, %v1345_v1  ;;  %965 = vmatprep.subr.bf16.mxu0 %v964_v55  ;;  %997 = vmatprep.subr.bf16.mxu1 %v964_v55 }
  0xb0   :  { %v553_v62 = vsub.f32 %v297_v56, %v521_v60 }
  0xb1   :  { %v552_v63 = vsub.f32 %v296_v59, %v520_v61  ;;  %v250_v3 = vpop.permute.xlu1 %249 }
  0xb2   :  { %v245_v4 = vpop.permute.xlu0 %244  ;;  %v585_v8 = vmax.f32 %v553_v62, 0.0  ;;  %v315_v11 = vmin.f32 %v250_v3, %v1354_v7 }
  0xb3   :  { %v584_v9 = vmax.f32 %v552_v63, 0.0  ;;  %v314_v14 = vmin.f32 %v245_v4, %v1354_v7 }
  0xb5   :  { %v966_v10 = vpack.c.bf16 %v585_v8, %v584_v9  ;;  %v474_v12 = vpop.permute.xlu1 %473 }
  0xb6   :  { %v469_v13 = vpop.permute.xlu0 %468  ;;  %v539_v15 = vmax.f32 %v474_v12, %v1345_v1 }
  0xb7   :  { %v538_v16 = vmax.f32 %v469_v13, %v1345_v1  ;;  %967 = vmatpush3.bf16.msra.mxu0 %v966_v10  ;;  %999 = vmatpush3.bf16.msra.mxu1 %v966_v10 }
  0xb8   :  { %v571_v17 = vsub.f32 %v315_v11, %v539_v15 }
  0xb9   :  { %v570_v18 = vsub.f32 %v314_v14, %v538_v16  ;;  %v170_v19 = vpop.permute.xlu1 %169 }
  0xba   :  { %v165_v20 = vpop.permute.xlu0 %164  ;;  %v603_v21 = vmax.f32 %v571_v17, 0.0  ;;  %v299_v24 = vmin.f32 %v170_v19, %v1354_v7 }
  0xbb   :  { %v602_v22 = vmax.f32 %v570_v18, 0.0  ;;  %v298_v27 = vmin.f32 %v165_v20, %v1354_v7 }
  0xbd   :  { %v968_v23 = vpack.c.bf16 %v603_v21, %v602_v22  ;;  %v394_v25 = vpop.permute.xlu1 %393 }
  0xbe   :  { %v389_v26 = vpop.permute.xlu0 %388  ;;  %v523_v28 = vmax.f32 %v394_v25, %v1345_v1 }
  0xbf   :  { %v522_v29 = vmax.f32 %v389_v26, %v1345_v1  ;;  %969 = vmatprep.subr.bf16.mxu0 %v968_v23  ;;  %1001 = vmatprep.subr.bf16.mxu1 %v968_v23 }
  0xc0   :  { %v555_v30 = vsub.f32 %v299_v24, %v523_v28 }
  0xc1   :  { %v554_v31 = vsub.f32 %v298_v27, %v522_v29  ;;  %v260_v32 = vpop.permute.xlu1 %259 }
  0xc2   :  { %v255_v33 = vpop.permute.xlu0 %254  ;;  %v587_v34 = vmax.f32 %v555_v30, 0.0  ;;  %v317_v37 = vmin.f32 %v260_v32, %v1354_v7 }
  0xc3   :  { %v586_v35 = vmax.f32 %v554_v31, 0.0  ;;  %v316_v40 = vmin.f32 %v255_v33, %v1354_v7 }
  0xc5   :  { %v970_v36 = vpack.c.bf16 %v587_v34, %v586_v35  ;;  %v484_v38 = vpop.permute.xlu1 %483 }
  0xc6   :  { %v479_v39 = vpop.permute.xlu0 %478  ;;  %v541_v41 = vmax.f32 %v484_v38, %v1345_v1 }
  0xc7   :  { %v540_v42 = vmax.f32 %v479_v39, %v1345_v1  ;;  %971 = vmatpush3.bf16.msra.mxu0 %v970_v36  ;;  %1003 = vmatpush3.bf16.msra.mxu1 %v970_v36 }
  0xc8   :  { %v573_v43 = vsub.f32 %v317_v37, %v541_v41 }
  0xc9   :  { %v572_v44 = vsub.f32 %v316_v40, %v540_v42  ;;  %v180_v47 = vpop.permute.xlu1 %179 }
  0xca   :  { %v175_v48 = vpop.permute.xlu0 %174  ;;  %v605_v49 = vmax.f32 %v573_v43, 0.0  ;;  %v301_v52 = vmin.f32 %v180_v47, %v1354_v7 }
  0xcb   :  { %v604_v50 = vmax.f32 %v572_v44, 0.0  ;;  %v300_v55 = vmin.f32 %v175_v48, %v1354_v7 }
  0xcd   :  { %v972_v51 = vpack.c.bf16 %v605_v49, %v604_v50  ;;  %v404_v53 = vpop.permute.xlu1 %403 }
  0xce   :  { %v399_v54 = vpop.permute.xlu0 %398  ;;  %v525_v56 = vmax.f32 %v404_v53, %v1345_v1 }
  0xcf   :  { %v524_v57 = vmax.f32 %v399_v54, %v1345_v1  ;;  %973 = vmatprep.subr.bf16.mxu0 %v972_v51  ;;  %1005 = vmatprep.subr.bf16.mxu1 %v972_v51 }
  0xd0   :  { %v557_v58 = vsub.f32 %v301_v52, %v525_v56 }
  0xd1   :  { %v556_v59 = vsub.f32 %v300_v55, %v524_v57  ;;  %v270_v60 = vpop.permute.xlu1 %269 }
  0xd2   :  { %v265_v61 = vpop.permute.xlu0 %264  ;;  %v589_v62 = vmax.f32 %v557_v58, 0.0  ;;  %v319_v4 = vmin.f32 %v270_v60, %v1354_v7 }
  0xd3   :  { %v588_v63 = vmax.f32 %v556_v59, 0.0  ;;  %v318_v10 = vmin.f32 %v265_v61, %v1354_v7 }
  0xd5   :  { %v974_v3 = vpack.c.bf16 %v589_v62, %v588_v63  ;;  %v494_v8 = vpop.permute.xlu1 %493 }
  0xd6   :  { %v489_v9 = vpop.permute.xlu0 %488  ;;  %v543_v11 = vmax.f32 %v494_v8, %v1345_v1 }
  0xd7   :  { %v542_v12 = vmax.f32 %v489_v9, %v1345_v1  ;;  %975 = vmatpush3.bf16.msra.mxu0 %v974_v3  ;;  %1007 = vmatpush3.bf16.msra.mxu1 %v974_v3 }
  0xd8   :  { %v575_v13 = vsub.f32 %v319_v4, %v543_v11 }
  0xd9   :  { %v574_v14 = vsub.f32 %v318_v10, %v542_v12  ;;  %v190_v15 = vpop.permute.xlu1 %189 }
  0xda   :  { %v185_v16 = vpop.permute.xlu0 %184  ;;  %v607_v17 = vmax.f32 %v575_v13, 0.0  ;;  %v303_v20 = vmin.f32 %v190_v15, %v1354_v7 }
  0xdb   :  { %v606_v18 = vmax.f32 %v574_v14, 0.0  ;;  %v302_v23 = vmin.f32 %v185_v16, %v1354_v7 }
  0xdd   :  { %v976_v19 = vpack.c.bf16 %v607_v17, %v606_v18  ;;  %v414_v21 = vpop.permute.xlu1 %413 }
  0xde   :  { %v409_v22 = vpop.permute.xlu0 %408  ;;  %v527_v24 = vmax.f32 %v414_v21, %v1345_v1 }
  0xdf   :  { %v526_v25 = vmax.f32 %v409_v22, %v1345_v1  ;;  %977 = vmatprep.subr.bf16.mxu0 %v976_v19  ;;  %1009 = vmatprep.subr.bf16.mxu1 %v976_v19 }
  0xe0   :  { %v559_v26 = vsub.f32 %v303_v20, %v527_v24 }
  0xe1   :  { %v558_v27 = vsub.f32 %v302_v23, %v526_v25  ;;  %v280_v28 = vpop.permute.xlu1 %279 }
  0xe2   :  { %v275_v29 = vpop.permute.xlu0 %274  ;;  %v591_v30 = vmax.f32 %v559_v26, 0.0  ;;  %v321_v33 = vmin.f32 %v280_v28, %v1354_v7  ;;  %v811_v28 = vld [vmem:[%s1527_s6] sm:$0xff] }
  0xe3   :  { %v590_v31 = vmax.f32 %v558_v27, 0.0  ;;  %v320_v36 = vmin.f32 %v275_v29, %v1354_v7 }
  0xe5   :  { %v978_v32 = vpack.c.bf16 %v591_v30, %v590_v31  ;;  %v504_v34 = vpop.permute.xlu1 %503 }
  0xe6   :  { %v499_v35 = vpop.permute.xlu0 %498  ;;  %v545_v37 = vmax.f32 %v504_v34, %v1345_v1  ;;  %v818_v34 = vld [vmem:[%s1528_s7 + $0x8] sm:$0xff] }
  0xe7   :  { %v544_v38 = vmax.f32 %v499_v35, %v1345_v1  ;;  %979 = vmatpush3.bf16.msra.mxu0 %v978_v32  ;;  %1011 = vmatpush3.bf16.msra.mxu1 %v978_v32 }
  0xe8   :  { %v577_v39 = vsub.f32 %v321_v33, %v545_v37 }
  0xe9   :  { %v576_v40 = vsub.f32 %v320_v36, %v544_v38  ;;  %v200_v41 = vpop.permute.xlu1 %199 }
  0xea   :  { %v195_v42 = vpop.permute.xlu0 %194  ;;  %v609_v43 = vmax.f32 %v577_v39, 0.0  ;;  %v305_v48 = vmin.f32 %v200_v41, %v1354_v7 }
  0xeb   :  { %v608_v44 = vmax.f32 %v576_v40, 0.0  ;;  %v304_v51 = vmin.f32 %v195_v42, %v1354_v7 }
  0xed   :  { %v980_v47 = vpack.c.bf16 %v609_v43, %v608_v44  ;;  %v424_v49 = vpop.permute.xlu1 %423 }
  0xee   :  { %v419_v50 = vpop.permute.xlu0 %418  ;;  %v529_v52 = vmax.f32 %v424_v49, %v1345_v1 }
  0xef   :  { %v528_v53 = vmax.f32 %v419_v50, %v1345_v1  ;;  %981 = vmatprep.subr.bf16.mxu0 %v980_v47  ;;  %1013 = vmatprep.subr.bf16.mxu1 %v980_v47 }
  0xf0   :  { %v561_v54 = vsub.f32 %v305_v48, %v529_v52 }
  0xf1   :  { %v560_v55 = vsub.f32 %v304_v51, %v528_v53  ;;  %v290_v56 = vpop.permute.xlu1 %289 }
  0xf2   :  { %v285_v57 = vpop.permute.xlu0 %284  ;;  %v593_v58 = vmax.f32 %v561_v54, 0.0  ;;  %v323_v61 = vmin.f32 %v290_v56, %v1354_v7 }
  0xf3   :  { %v592_v59 = vmax.f32 %v560_v55, 0.0  ;;  %v322_v3 = vmin.f32 %v285_v57, %v1354_v7 }
  0xf5   :  { %v982_v60 = vpack.c.bf16 %v593_v58, %v592_v59  ;;  %v514_v62 = vpop.permute.xlu1 %513 }
  0xf6   :  { %v509_v63 = vpop.permute.xlu0 %508  ;;  %v547_v4 = vmax.f32 %v514_v62, %v1345_v1 }
  0xf7   :  { %v546_v8 = vmax.f32 %v509_v63, %v1345_v1  ;;  %983 = vmatpush3.bf16.msra.mxu0 %v982_v60  ;;  %1015 = vmatpush3.bf16.msra.mxu1 %v982_v60 }
  0xf8   :  { %v579_v9 = vsub.f32 %v323_v61, %v547_v4 }
  0xf9   :  { %v578_v10 = vsub.f32 %v322_v3, %v546_v8  ;;  %v210_v11 = vpop.permute.xlu1 %209 }
  0xfa   :  { %v205_v12 = vpop.permute.xlu0 %204  ;;  %v611_v13 = vmax.f32 %v579_v9, 0.0  ;;  %v307_v16 = vmin.f32 %v210_v11, %v1354_v7 }
  0xfb   :  { %v610_v14 = vmax.f32 %v578_v10, 0.0  ;;  %v306_v19 = vmin.f32 %v205_v12, %v1354_v7 }
  0xfd   :  { %v984_v15 = vpack.c.bf16 %v611_v13, %v610_v14  ;;  %v434_v17 = vpop.permute.xlu1 %433 }
  0xfe   :  { %v429_v18 = vpop.permute.xlu0 %428  ;;  %v531_v20 = vmax.f32 %v434_v17, %v1345_v1 }
  0xff   :  { %v530_v21 = vmax.f32 %v429_v18, %v1345_v1  ;;  %985 = vmatprep.subr.bf16.mxu0 %v984_v15  ;;  %1017 = vmatprep.subr.bf16.mxu1 %v984_v15 }
 0x100   :  { %v563_v22 = vsub.f32 %v307_v16, %v531_v20 }
 0x101   :  { %v562_v23 = vsub.f32 %v306_v19, %v530_v21 }
 0x102   :  { %v595_v24 = vmax.f32 %v563_v22, 0.0 }
 0x103   :  { %v594_v25 = vmax.f32 %v562_v23, 0.0 }
 0x105   :  { %v986_v26 = vpack.c.bf16 %v595_v24, %v594_v25 }
 0x107   :  { %987 = vmatpush3.bf16.msra.mxu0 %v986_v26  ;;  %1019 = vmatpush3.bf16.msra.mxu1 %v986_v26 }
 0x10a   :  { %711 = vmatmul.mubr.f32.vlgmr.msra.gmra.mrb[0].mxu0 %v1372_v45  ;;  %792 = vmatmul.mubr.f32.vlgmr.msra.gmra.mrb[0].mxu1 %v1374_v46  ;;  %v817_v45 = vld [vmem:[%s1528_s7] sm:$0xff] }
 0x10b   :  { %715 = vmatprep.mubr.f32.mxu0 %v1378_v0  ;;  %796 = vmatprep.mubr.f32.mxu1 %v1380_v2 }
 0x10e   :  { %716 = vmatmul.mubr.f32.gmra.mrb[2].mxu0 %v1384_v5  ;;  %797 = vmatmul.mubr.f32.gmra.mrb[2].mxu1 %v1386_v6  ;;  %v812_v6 = vld [vmem:[%s1527_s6 + $0x8] sm:$0xff]  ;;  %s1028_s6 = scalar_lea.vmem %s851_s12, 256 }
 0x10f   :  { %p1029_p0 = scmp.ne.s32.totalorder %s851_s12, %s1028_s6  ;;  %p1034_p2 = scmp.lt.s32.totalorder %s1028_s6, %s1028_s6 }
 0x111   :  { %p1035_p3 = por %p1034_p2, %p1033_p1 }
 0x113   :  { %p1036_p4 = pnand %p1035_p3, %p1029_p0 }
 0x1dd   :  { %v912_v1 = vpop.f32.mrb[0].mxu0  ;;  %v950_v7 = vpop.f32.mrb[0].mxu1 }
 0x1de   :  { %v913_v27 = vpop.f32.mrb[1].mxu0  ;;  %v951_v29 = vpop.f32.mrb[1].mxu1 }
 0x1df   :  { %v914_v46 = vadd.f32 %v913_v27, %v912_v1  ;;  %v952_v0 = vadd.f32 %v951_v29, %v950_v7 }
 0x1e1   :  { %v813_v30 = vadd.f32 %v914_v46, %v811_v28  ;;  %v819_v2 = vadd.f32 %v952_v0, %v817_v45  ;;  %v915_v31 = vpop.f32.mrb[2].mxu0  ;;  %v953_v5 = vpop.f32.mrb[2].mxu1 }
 0x1e2   :  { %v916_v32 = vpop.f32.mrb[3].mxu0  ;;  %v954_v33 = vpop.f32.mrb[3].mxu1 }
 0x1e3   :  { %821 = vst [vmem:[#allocation6] sm:$0xff] %v813_v30  ;;  %v825_v35 = vand.u32 2147483647, %v813_v30  ;;  %823 = vst [vmem:[#allocation8] sm:$0xff] %v819_v2  ;;  %v827_v36 = vand.u32 2147483647, %v819_v2  ;;  %v917_v37 = vadd.f32 %v916_v32, %v915_v31  ;;  %v955_v38 = vadd.f32 %v954_v33, %v953_v5 }
 0x1e5   :  { %v814_v39 = vadd.f32 %v917_v37, %v812_v6  ;;  %v820_v40 = vadd.f32 %v955_v38, %v818_v34  ;;  %v829_v41 = vmax.f32.f32 %v825_v35, %v827_v36 }
 0x1e7   :  { %822 = vst [vmem:[#allocation6 + $0x8] sm:$0xff] %v814_v39  ;;  %v826_v42 = vand.u32 2147483647, %v814_v39  ;;  %824 = vst [vmem:[#allocation8 + $0x8] sm:$0xff] %v820_v40  ;;  %v828_v43 = vand.u32 2147483647, %v820_v40 }
 0x1e8   :  { %831 = vst [vmem:[#allocation4] sm:$0xff] %v829_v41 }
 0x1e9   :  { %1039 = shalt.err (!%p1036_p4)
}
 0x1ea   :  { %s1040_s18 = scalar_lea.hbm %s1530_s9, 256 }
 0x1eb   :  { %p1041_p5 = scmp.ne.s32.totalorder %s1530_s9, %s1040_s18  ;;  %p1044_p6 = scmp.lt.u32.totalorder %s1040_s18, %s1530_s9 }
 0x1ed   :  { %p1046_p7 = pnand %p1044_p6, %p1041_p5 }
 0x1ef   :  { %1049 = shalt.err (!%p1046_p7)
}
 0x1f0   :  { %s1102_s22 = smov 128   ;;  %s1103_s23 = smov 8   ;;  %v830_v44 = vmax.f32.f32 %v826_v42, %v828_v43 }
 0x1f1   :  { %856 = dma.vmem_to_hbm [thread:$0]  %s851_s12, 256, %s1530_s9, [#allocation7], %s1102_s22, %s1102_s22, %s1103_s23  }
 0x1f2   :  { %s1050_s4 = scalar_lea.vmem %s1462_s14, 256  ;;  %p1055_p9 = scmp.lt.s32.totalorder %s1462_s14, %s1462_s14 }
 0x1f3   :  { %p1051_p8 = scmp.ne.s32.totalorder %s1462_s14, %s1050_s4  ;;  %p1056_p10 = scmp.lt.s32.totalorder %s1050_s4, %s1050_s4 }
 0x1f5   :  { %p1057_p11 = por %p1056_p10, %p1055_p9 }
 0x1f7   :  { %p1058_p12 = pnand %p1057_p11, %p1051_p8 }
 0x1f9   :  { %1061 = shalt.err (!%p1058_p12)
}
 0x1fa   :  { %s1062_s3 = scalar_lea.hbm %s1531_s10, 256 }
 0x1fb   :  { %p1063_p13 = scmp.ne.s32.totalorder %s1531_s10, %s1062_s3  ;;  %p1066_p0 = scmp.lt.u32.totalorder %s1062_s3, %s1531_s10 }
 0x1fd   :  { %p1068_p1 = pnand %p1066_p0, %p1063_p13 }
 0x1ff   :  { %1071 = shalt.err (!%p1068_p1)
}
 0x200   :  { %868 = dma.vmem_to_hbm [thread:$0]  %s1462_s14, 256, %s1531_s10, [#allocation7], %s1102_s22, %s1102_s22, %s1103_s23   ;;  %832 = vst [vmem:[#allocation4 + $0x8] sm:$0xff] %v830_v44 }
 0x201   :  { %s1072_s30 = scalar_lea.vmem %s1464_s16, 256  ;;  %p1077_p3 = scmp.lt.s32.totalorder %s1464_s16, %s1464_s16 }
 0x202   :  { %p1073_p2 = scmp.ne.s32.totalorder %s1464_s16, %s1072_s30  ;;  %p1078_p4 = scmp.lt.s32.totalorder %s1072_s30, %s1072_s30 }
 0x204   :  { %p1079_p5 = por %p1078_p4, %p1077_p3 }
 0x206   :  { %p1080_p6 = pnand %p1079_p5, %p1073_p2 }
 0x208   :  { %1083 = shalt.err (!%p1080_p6)
}
 0x209   :  { %s1084_s13 = scalar_lea.hbm %s1529_s8, 256 }
 0x20a   :  { %p1085_p7 = scmp.ne.s32.totalorder %s1529_s8, %s1084_s13  ;;  %p1088_p8 = scmp.lt.u32.totalorder %s1084_s13, %s1529_s8 }
 0x20c   :  { %p1090_p9 = pnand %p1088_p8, %p1085_p7 }
 0x20e   :  { %1093 = shalt.err (!%p1090_p9)
}
 0x20f   :  { %844 = dma.vmem_to_hbm [thread:$0]  %s1464_s16, 256, %s1529_s8, [#allocation5], %s1102_s22, %s1102_s22, %s1103_s23  }
 0x210   :  { %1094 = dma.done.wait [#allocation5], 256  }
 0x211   :  { %1095 = vsyncadd [#allocation5], 4294967040 }
 0x212   :  { %1096 = dma.done.wait [#allocation7], 512  }
 0x213   :  { %1097 = vsyncadd [#allocation7], 4294966784 }
 0x214   :  { %878 = vsyncpa [#allocation5], 1 }
 0x215   :  { %879 = vsyncpa [#allocation7], 1 }

</bundles_post_ra>
